<compile_context>
chip_gen: v7x
topology: tpu7x:2x2x1
jax: 0.10.0
libtpu: 0.0.40
codegen_flags: <defaults>
</compile_context>

<pallas_src>
import jax
import jax.numpy as jnp
from jax.experimental import pallas as pl
from jax.experimental.pallas import tpu as pltpu


def attflat_kernel(x_ref, seg_ref, w1_ref, b1_ref, w2_ref, wm_ref, bm_ref,
                   out_ref):
    # x_ref:   (TB*S, H_pad)  TB batch elements, sequence-flattened (compute dtype)
    # seg_ref: (nb, TB*S)     f32 rows: -1e9 at masked positions, b2 elsewhere
    TB = out_ref.shape[0]
    L = x_ref.shape[0]              # = TB * S
    S = L // TB

    x = x_ref[...]                                                  # (L, H_pad)

    # ---- MLP hidden -> ff: MXU matmul, f32 accumulation; bias + ReLU
    # epilogue in the compute dtype (bf16 packs 2/lane on v6e/v7x VALUs;
    # pass compute_dtype=f32 on v5e if this shows up in profiles). ----
    h = jnp.dot(x, w1_ref[...], preferred_element_type=jnp.float32)
    h = jnp.maximum(h.astype(b1_ref.dtype) + b1_ref[...], 0.0)      # (L, FF_pad)

    # ---- ff -> 1 logit per row, produced lane-dense as a (1, L) row.
    # Contract the LAST dims of both operands (A @ B^T): same MXU pattern as
    # q @ k^T in flash attention, so no XLU transpose of the large h tile. ----
    logits = jax.lax.dot_general(
        w2_ref[...], h, dimension_numbers=(((1,), (1,)), ((), ())),
        preferred_element_type=jnp.float32)                         # (1, L)

    # ---- masked_fill, built in-kernel (nothing (TB*S)-wide streamed from HBM).
    NEG = jnp.float32(-1e9)         # exact masked_fill value of the module
    OFF = jnp.float32(-2e9)         # kills cross-batch columns inside the tile
    srow = seg_ref[pl.ds(pl.program_id(0), 1), :]                   # (1, L) f32
    lg = jnp.where(srow <= jnp.float32(-0.5e9), NEG, logits + srow)  # (1, L)

    # Block-diagonal select: softmax row t only "sees" its own S columns.
    row = jax.lax.broadcasted_iota(jnp.int32, (TB, L), 0)
    col = jax.lax.broadcasted_iota(jnp.int32, (TB, L), 1)
    start = row * S
    z = jnp.where((col >= start) & (col < start + S), lg, OFF)      # (TB, L)

    # ---- per-batch softmax over the lane axis (f32; EUP reciprocal). ----
    m = jnp.max(z, axis=-1, keepdims=True)
    e = jnp.exp(z - m)              # off-diagonal / masked columns underflow to 0
    p = e * pl.reciprocal(jnp.sum(e, axis=-1, keepdims=True), approx=True)

    # ---- weighted sum over the sequence on the MXU: (TB, L) @ (L, H_pad). ----
    x_atted = jnp.dot(p.astype(x.dtype), x,
                      preferred_element_type=jnp.float32)           # (TB, H_pad)

    # ---- linear_merge ----
    out_ref[...] = (jnp.dot(x_atted.astype(wm_ref.dtype), wm_ref[...],
                            preferred_element_type=jnp.float32)
                    + bm_ref[...]).astype(out_ref.dtype)


def _pick_block_b(B, S):
    """Batch elements per grid step (multiple of 8)."""
    # Target TB*S ~ 256 rows to fill the MXU M dimension without letting the
    # O(TB^2*S) block-diagonal softmax waste grow; TB >= 8 (sublane tile).
    tb = max(8, min(64, 256 // max(S, 1)))
    tb = max(8, (tb // 8) * 8)
    if B >= 16:
        # Keep at least 2 grid steps so both v7x TensorCores get work.
        tb = min(tb, max(8, (B // 2) // 8 * 8))
    else:
        # Tiny batch: don't pad B beyond a single block.
        tb = min(tb, max(8, pl.cdiv(B, 8) * 8))
    return tb


def _vmem_limit_bytes(TB, S, H_pad, FF_pad, nb, compute_itemsize):
    """Derive a VMEM limit from the actual block footprint, capped per chip."""
    L = TB * S
    need = (
        2 * L * H_pad * compute_itemsize            # x block, double-buffered
        + 2 * TB * H_pad * 4                        # out block, double-buffered
        + nb * L * 4                                # resident seg rows
        + (H_pad * FF_pad + H_pad * H_pad
           + 2 * FF_pad) * compute_itemsize         # weights, single-buffered
        + (FF_pad + H_pad) * 4                      # b1 / bm
        + L * FF_pad * (4 + compute_itemsize)       # h (f32 acc + compute copy)
        + 6 * TB * L * 4                            # z / e / p / iota temporaries
    )
    try:
        cap = getattr(pltpu.get_tpu_info(), "vmem_capacity_bytes",
                      64 * 1024 * 1024)
    except Exception:
        cap = 64 * 1024 * 1024                      # conservative (v7x) fallback
    # Leave headroom for compiler-internal scratch (matters most on v7x: 64 MiB).
    return int(min(max(2 * need, 32 * 1024 * 1024), int(0.75 * cap)))


def att_flat(x, x_mask, params, *, block_b=None, compute_dtype=jnp.bfloat16):
    """x: (B, S, H) float; x_mask: (B, 1, 1, S) bool (True = masked position).

    compute_dtype feeds the MXU matmuls (bf16 default: halves HBM traffic and
    matches bf16-native MXUs). Accumulation, softmax and bias-adds stay f32.
    block_b, if given, should be a multiple of 8.
    """
    B, S, H = x.shape
    w1, b1, w2, b2, wm, bm = params
    FF = w1.shape[1]
    f32 = jnp.float32
    cd = jnp.dtype(compute_dtype)

    TB = _pick_block_b(B, S) if block_b is None else block_b
    B_pad = pl.cdiv(B, TB) * TB
    H_pad = pl.cdiv(H, 128) * 128
    FF_pad = pl.cdiv(FF, 128) * 128
    nb = B_pad // TB
    L = TB * S

    # ---- x: cast once to the compute dtype; pad only when actually needed
    # (jnp.pad is an extra HBM pass; skipped in the aligned production case).
    x_c = x.astype(cd)
    if B_pad != B or H_pad != H:
        x_c = jnp.pad(x_c, ((0, B_pad - B), (0, 0), (0, H_pad - H)))
    x2 = x_c.reshape(B_pad * S, H_pad)

    # ---- weights: zero-pad to lane-aligned shapes (math-exact), cast to cd.
    w1p = jnp.pad(w1.astype(cd), ((0, H_pad - H), (0, FF_pad - FF)))
    b1p = jnp.pad(b1.astype(cd).reshape(1, FF), ((0, 0), (0, FF_pad - FF)))
    w2r = jnp.pad(w2.astype(cd).reshape(FF, 1).T, ((0, 0), (0, FF_pad - FF)))
    wmp = jnp.pad(wm.astype(cd), ((0, H_pad - H), (0, H_pad - H)))
    bmp = jnp.pad(bm.astype(f32).reshape(1, H), ((0, 0), (0, H_pad - H)))

    # ---- per-position attention-bias rows (tiny: B_pad*S f32 values).
    # Row b of segrow is the flattened per-(batch, position) value for batch
    # block b: exactly -1e9 where masked, b2 elsewhere.
    NEG = jnp.float32(-1e9)
    mask2 = x_mask.reshape(B, S)
    seg = jnp.where(mask2, NEG, b2.reshape(()).astype(f32))          # (B, S)
    if B_pad != B:
        seg = jnp.pad(seg, ((0, B_pad - B), (0, 0)))                 # pad rows: unmasked
    segrow = seg.reshape(nb, L)

    grid_spec = pltpu.PrefetchScalarGridSpec(
        num_scalar_prefetch=0,
        grid=(nb,),
        in_specs=[
            pl.BlockSpec((TB * S, H_pad), lambda b: (b, 0)),          # x rows
            pl.BlockSpec((nb, L), lambda b: (0, 0),
                         pipeline_mode=pl.Buffered(1)),               # seg (resident)
            pl.BlockSpec((H_pad, FF_pad), lambda b: (0, 0),
                         pipeline_mode=pl.Buffered(1)),               # w1
            pl.BlockSpec((1, FF_pad), lambda b: (0, 0),
                         pipeline_mode=pl.Buffered(1)),               # b1
            pl.BlockSpec((1, FF_pad), lambda b: (0, 0),
                         pipeline_mode=pl.Buffered(1)),               # w2 (row)
            pl.BlockSpec((H_pad, H_pad), lambda b: (0, 0),
                         pipeline_mode=pl.Buffered(1)),               # wm
            pl.BlockSpec((1, H_pad), lambda b: (0, 0),
                         pipeline_mode=pl.Buffered(1)),               # bm
        ],
        out_specs=pl.BlockSpec((TB, H_pad), lambda b: (b, 0)),
    )

    out = pl.pallas_call(
        attflat_kernel,
        out_shape=jax.ShapeDtypeStruct((B_pad, H_pad), f32),
        grid_spec=grid_spec,
        compiler_params=pltpu.CompilerParams(
            dimension_semantics=("parallel",),
            vmem_limit_bytes=_vmem_limit_bytes(TB, S, H_pad, FF_pad, nb,
                                               cd.itemsize),
        ),
    )(x2, segrow, w1p, b1p, w2r, wmp, bmp)

    return out[:B, :H]


def att_flat_reference(x, x_mask, params):
    """Pure-JAX reference mirroring the PyTorch forward."""
    w1, b1, w2, b2, wm, bm = params
    h = jnp.maximum(x @ w1 + b1, 0.0)            # (B, S, FF)
    att = h @ w2 + b2                            # (B, S, 1)
    mask = x_mask.reshape(x.shape[0], x.shape[1], 1)
    att = jnp.where(mask, -1e9, att)
    att = jax.nn.softmax(att, axis=1)
    x_atted = jnp.sum(att * x, axis=1)           # (B, H)
    return x_atted @ wm + bm


if __name__ == "__main__":
    B, S, H, FF = 2, 8, 32, 64

    key = jax.random.PRNGKey(0)
    kx, k1, k2, k3, k4, k5, k6 = jax.random.split(key, 7)

    x = jax.random.normal(kx, (B, S, H), dtype=jnp.float32)
    # mask: last two sequence positions of batch 1 are padded (True = masked)
    mask_rows = jnp.array([[False] * S,
                           [False] * (S - 2) + [True, True]])
    x_mask = mask_rows.reshape(B, 1, 1, S)

    # Deterministic parameter init (weights stored as (in, out)).
    w1 = jax.random.normal(k1, (H, FF), dtype=jnp.float32) * 0.1
    b1 = jax.random.normal(k2, (1, FF), dtype=jnp.float32) * 0.1
    w2 = jax.random.normal(k3, (FF, 1), dtype=jnp.float32) * 0.1
    b2 = jax.random.normal(k4, (1, 1), dtype=jnp.float32) * 0.1
    wm = jax.random.normal(k5, (H, H), dtype=jnp.float32) * 0.1
    bm = jax.random.normal(k6, (1, H), dtype=jnp.float32) * 0.1
    params = (w1, b1, w2, b2, wm, bm)

    out = att_flat(x, x_mask, params)            # bf16 compute path (default)
    out = jax.block_until_ready(out)

    ref = att_flat_reference(x, x_mask, params)
    assert out.shape == (B, H)
    # Tolerance covers bf16 MXU operands and the approximate EUP reciprocal.
    assert jnp.allclose(out, ref, atol=3e-2, rtol=3e-2), (out, ref)

    print("KERNEL_OK")
</pallas_src>

<mosaic_0001>
module attributes {stable_mosaic.version = 11 : i64} {
  func.func @attflat_kernel(%arg0: i32, %arg1: memref<64x128xbf16, #tpu.memory_space<vmem>>, %arg2: memref<1x64xf32, #tpu.memory_space<vmem>>, %arg3: memref<128x128xbf16, #tpu.memory_space<vmem>>, %arg4: memref<1x128xbf16, #tpu.memory_space<vmem>>, %arg5: memref<1x128xbf16, #tpu.memory_space<vmem>>, %arg6: memref<128x128xbf16, #tpu.memory_space<vmem>>, %arg7: memref<1x128xf32, #tpu.memory_space<vmem>>, %arg8: memref<8x128xf32, #tpu.memory_space<vmem>>) attributes {dimension_semantics = [#tpu.dimension_semantics<parallel>], iteration_bounds = array<i64: 1>, scalar_prefetch = 0 : i64, scratch_operands = 0 : i64, tpu.core_type = #tpu.core_type<tc>, window_params = [{transform_indices = @transform_0, window_bounds = array<i64: 64, 128>}, {pipeline_mode = #tpu.pipeline_mode<synchronous>, transform_indices = @transform_1, window_bounds = array<i64: 1, 64>}, {pipeline_mode = #tpu.pipeline_mode<synchronous>, transform_indices = @transform_2, window_bounds = array<i64: 128, 128>}, {pipeline_mode = #tpu.pipeline_mode<synchronous>, transform_indices = @transform_3, window_bounds = array<i64: 1, 128>}, {pipeline_mode = #tpu.pipeline_mode<synchronous>, transform_indices = @transform_4, window_bounds = array<i64: 1, 128>}, {pipeline_mode = #tpu.pipeline_mode<synchronous>, transform_indices = @transform_5, window_bounds = array<i64: 128, 128>}, {pipeline_mode = #tpu.pipeline_mode<synchronous>, transform_indices = @transform_6, window_bounds = array<i64: 1, 128>}, {transform_indices = @transform_7, window_bounds = array<i64: 8, 128>}]} {
    %c0 = arith.constant 0 : index
    %c0_0 = arith.constant 0 : index
    %0 = vector.load %arg1[%c0, %c0_0] : memref<64x128xbf16, #tpu.memory_space<vmem>>, vector<64x128xbf16>
    %c0_1 = arith.constant 0 : index
    %c0_2 = arith.constant 0 : index
    %1 = vector.load %arg3[%c0_1, %c0_2] : memref<128x128xbf16, #tpu.memory_space<vmem>>, vector<128x128xbf16>
    %cst = arith.constant dense<0.000000e+00> : vector<64x128xf32>
    %2 = tpu.matmul %0, %1, %cst {dimension_numbers = #tpu.dot_dimension_numbers<[1], [0], [0], [1], [0, 0, 1, 1], [], []>} : vector<64x128xbf16>, vector<128x128xbf16>, vector<64x128xf32> -> vector<64x128xf32>
    %3 = arith.truncf %2 : vector<64x128xf32> to vector<64x128xbf16>
    %c0_3 = arith.constant 0 : index
    %c0_4 = arith.constant 0 : index
    %4 = vector.load %arg4[%c0_3, %c0_4] : memref<1x128xbf16, #tpu.memory_space<vmem>>, vector<1x128xbf16>
    %5 = vector.broadcast %4 : vector<1x128xbf16> to vector<64x128xbf16>
    %6 = arith.addf %3, %5 : vector<64x128xbf16>
    %cst_5 = arith.constant 0.000000e+00 : bf16
    %7 = vector.broadcast %cst_5 : bf16 to vector<64x128xbf16>
    %8 = arith.maximumf %6, %7 : vector<64x128xbf16>
    %c0_6 = arith.constant 0 : index
    %c0_7 = arith.constant 0 : index
    %9 = vector.load %arg5[%c0_6, %c0_7] : memref<1x128xbf16, #tpu.memory_space<vmem>>, vector<1x128xbf16>
    %cst_8 = arith.constant dense<0.000000e+00> : vector<1x64xf32>
    %10 = tpu.matmul %9, %8, %cst_8 {dimension_numbers = #tpu.dot_dimension_numbers<[1], [1], [0], [0], [0, 0, 1, 0], [], []>} : vector<1x128xbf16>, vector<64x128xbf16>, vector<1x64xf32> -> vector<1x64xf32>
    %11 = arith.index_cast %arg0 : i32 to index
    %c0_9 = arith.constant 0 : index
    %12 = vector.load %arg2[%11, %c0_9] : memref<1x64xf32, #tpu.memory_space<vmem>>, vector<1x64xf32>
    %cst_10 = arith.constant -5.000000e+08 : f32
    %13 = vector.broadcast %cst_10 : f32 to vector<1x64xf32>
    %14 = arith.cmpf ole, %12, %13 : vector<1x64xf32>
    %15 = arith.addf %10, %12 : vector<1x64xf32>
    %cst_11 = arith.constant -1.000000e+09 : f32
    %16 = vector.broadcast %cst_11 : f32 to vector<1x64xf32>
    %17 = arith.select %14, %16, %15 : vector<1x64xi1>, vector<1x64xf32>
    %18 = tpu.iota {dimensions = array<i32: 0>} : vector<8x64xi32>
    %19 = tpu.iota {dimensions = array<i32: 1>} : vector<8x64xi32>
    %c8_i32 = arith.constant 8 : i32
    %20 = vector.broadcast %c8_i32 : i32 to vector<8x64xi32>
    %21 = arith.muli %18, %20 : vector<8x64xi32>
    %22 = arith.cmpi sge, %19, %21 : vector<8x64xi32>
    %c8_i32_12 = arith.constant 8 : i32
    %23 = vector.broadcast %c8_i32_12 : i32 to vector<8x64xi32>
    %24 = arith.addi %21, %23 : vector<8x64xi32>
    %25 = arith.cmpi slt, %19, %24 : vector<8x64xi32>
    %26 = arith.andi %22, %25 : vector<8x64xi1>
    %cst_13 = arith.constant -2.000000e+09 : f32
    %27 = vector.shape_cast %17 : vector<1x64xf32> to vector<1x64xf32>
    %28 = vector.broadcast %27 : vector<1x64xf32> to vector<8x64xf32>
    %29 = vector.broadcast %cst_13 : f32 to vector<8x64xf32>
    %30 = arith.select %26, %28, %29 : vector<8x64xi1>, vector<8x64xf32>
    %cst_14 = arith.constant dense<0xFF800000> : vector<8xf32>
    %31 = vector.multi_reduction <maximumf>, %30, %cst_14 [1] : vector<8x64xf32> to vector<8xf32>
    %32 = vector.shape_cast %31 : vector<8xf32> to vector<8x1xf32>
    %33 = vector.broadcast %32 : vector<8x1xf32> to vector<8x64xf32>
    %34 = arith.subf %30, %33 : vector<8x64xf32>
    %35 = math.exp %34 : vector<8x64xf32>
    %cst_15 = arith.constant dense<0.000000e+00> : vector<8xf32>
    %36 = vector.multi_reduction <add>, %35, %cst_15 [1] : vector<8x64xf32> to vector<8xf32>
    %37 = vector.shape_cast %36 : vector<8xf32> to vector<8x1xf32>
    %38 = tpu.reciprocal %37 {approx = true} : vector<8x1xf32> -> vector<8x1xf32>
    %39 = vector.broadcast %38 : vector<8x1xf32> to vector<8x64xf32>
    %40 = arith.mulf %35, %39 : vector<8x64xf32>
    %41 = arith.truncf %40 : vector<8x64xf32> to vector<8x64xbf16>
    %cst_16 = arith.constant dense<0.000000e+00> : vector<8x128xf32>
    %42 = tpu.matmul %41, %0, %cst_16 {dimension_numbers = #tpu.dot_dimension_numbers<[1], [0], [0], [1], [0, 0, 1, 1], [], []>} : vector<8x64xbf16>, vector<64x128xbf16>, vector<8x128xf32> -> vector<8x128xf32>
    %43 = arith.truncf %42 : vector<8x128xf32> to vector<8x128xbf16>
    %c0_17 = arith.constant 0 : index
    %c0_18 = arith.constant 0 : index
    %44 = vector.load %arg6[%c0_17, %c0_18] : memref<128x128xbf16, #tpu.memory_space<vmem>>, vector<128x128xbf16>
    %cst_19 = arith.constant dense<0.000000e+00> : vector<8x128xf32>
    %45 = tpu.matmul %43, %44, %cst_19 {dimension_numbers = #tpu.dot_dimension_numbers<[1], [0], [0], [1], [0, 0, 1, 1], [], []>} : vector<8x128xbf16>, vector<128x128xbf16>, vector<8x128xf32> -> vector<8x128xf32>
    %c0_20 = arith.constant 0 : index
    %c0_21 = arith.constant 0 : index
    %46 = vector.load %arg7[%c0_20, %c0_21] : memref<1x128xf32, #tpu.memory_space<vmem>>, vector<1x128xf32>
    %47 = vector.broadcast %46 : vector<1x128xf32> to vector<8x128xf32>
    %48 = arith.addf %45, %47 : vector<8x128xf32>
    %c0_22 = arith.constant 0 : index
    %c0_23 = arith.constant 0 : index
    %49 = vector.load %arg8[%c0_22, %c0_23] : memref<8x128xf32, #tpu.memory_space<vmem>>, vector<8x128xf32>
    tpu.vector_store %arg8[%c0_22, %c0_23], %48 {strides = array<i32>} : memref<8x128xf32, #tpu.memory_space<vmem>>, vector<8x128xf32>,
    return
  }
  func.func @transform_0(%arg0: i32) -> (i32, i32) {
    %c0_i32 = arith.constant 0 : i32
    %c0_i32_0 = arith.constant 0 : i32
    return %arg0, %c0_i32 : i32, i32
  }
  func.func @transform_1(%arg0: i32) -> (i32, i32) {
    %c0_i32 = arith.constant 0 : i32
    %c0_i32_0 = arith.constant 0 : i32
    %c0_i32_1 = arith.constant 0 : i32
    return %c0_i32, %c0_i32_0 : i32, i32
  }
  func.func @transform_2(%arg0: i32) -> (i32, i32) {
    %c0_i32 = arith.constant 0 : i32
    %c0_i32_0 = arith.constant 0 : i32
    %c0_i32_1 = arith.constant 0 : i32
    return %c0_i32, %c0_i32_0 : i32, i32
  }
  func.func @transform_3(%arg0: i32) -> (i32, i32) {
    %c0_i32 = arith.constant 0 : i32
    %c0_i32_0 = arith.constant 0 : i32
    %c0_i32_1 = arith.constant 0 : i32
    return %c0_i32, %c0_i32_0 : i32, i32
  }
  func.func @transform_4(%arg0: i32) -> (i32, i32) {
    %c0_i32 = arith.constant 0 : i32
    %c0_i32_0 = arith.constant 0 : i32
    %c0_i32_1 = arith.constant 0 : i32
    return %c0_i32, %c0_i32_0 : i32, i32
  }
  func.func @transform_5(%arg0: i32) -> (i32, i32) {
    %c0_i32 = arith.constant 0 : i32
    %c0_i32_0 = arith.constant 0 : i32
    %c0_i32_1 = arith.constant 0 : i32
    return %c0_i32, %c0_i32_0 : i32, i32
  }
  func.func @transform_6(%arg0: i32) -> (i32, i32) {
    %c0_i32 = arith.constant 0 : i32
    %c0_i32_0 = arith.constant 0 : i32
    %c0_i32_1 = arith.constant 0 : i32
    return %c0_i32, %c0_i32_0 : i32, i32
  }
  func.func @transform_7(%arg0: i32) -> (i32, i32) {
    %c0_i32 = arith.constant 0 : i32
    %c0_i32_0 = arith.constant 0 : i32
    return %arg0, %c0_i32 : i32, i32
  }
}

</mosaic_0001>

<bundles_post_ra>
// kernel: tpu_custom_call.1
= control target key start
LH: loop header
LB: loop body
LE: loop exit
PB: predicated region body
PF: predicated region fallthrough
CT: control target
= control target key end

     0   :  { %12 = vsyncpa [#allocation3], 0  ;;  %s893_s0 = inlined_call_operand.hbm [shape: bf16[64,128], index: 0, kind: input, shape index: {}]   ;;  %s894_s1 = inlined_call_operand.vmem [shape: f32[1,64], index: 1, kind: input, shape index: {}]   ;;  %s895_s2 = inlined_call_operand.hbm [shape: bf16[128,128], index: 2, kind: input, shape index: {}]   ;;  %s896_s3 = inlined_call_operand.vmem [shape: bf16[1,128], index: 3, kind: input, shape index: {}]   ;;  %s897_s4 = inlined_call_operand.vmem [shape: bf16[1,128], index: 4, kind: input, shape index: {}]   ;;  %s898_s5 = inlined_call_operand.hbm [shape: bf16[128,128], index: 5, kind: input, shape index: {}]   ;;  %s899_s6 = inlined_call_operand.vmem [shape: f32[1,128], index: 6, kind: input, shape index: {}]   ;;  %s900_s7 = inlined_call_operand.hbm [shape: f32[8,128], index: 7, kind: output, shape index: {}]  }
   0x1   :  { %13 = vsyncpa [#allocation6], 0 }
   0x2   :  { %14 = vsyncpa [#allocation4], 0  ;;  %s743_s24 = smov [#allocation5]   ;;  %s744_s26 = smov [#allocation2]  }
   0x3   :  { %s34_s25 = sshll.u32 %s743_s24, 4  ;;  %s20_s27 = sshll.u32 %s744_s26, 4  ;;  %s35_s25 = int_to_ptr.vmem [resolvable:$true] %s34_s25  ;;  %s792_s27 = int_to_ptr.vmem [resolvable:$true] %s20_s27 }
   0x4   :  { %s649_s30 = scalar_lea.hbm %s895_s2, 1024 }
   0x5   :  { %p650_p0 = scmp.ne.s32.totalorder %s895_s2, %s649_s30  ;;  %p653_p1 = scmp.lt.u32.totalorder %s649_s30, %s895_s2 }
   0x7   :  { %p655_p2 = pnand %p653_p1, %p650_p0 }
   0x9   :  { %658 = shalt.err (!%p655_p2)
}
   0xa   :  { %s659_s12 = scalar_lea.vmem %s35_s25, 1024  ;;  %p664_p4 = scmp.lt.s32.totalorder %s35_s25, %s35_s25 }
   0xb   :  { %p660_p3 = scmp.ne.s32.totalorder %s35_s25, %s659_s12  ;;  %p665_p5 = scmp.lt.s32.totalorder %s659_s12, %s659_s12 }
   0xd   :  { %p666_p6 = por %p665_p5, %p664_p4 }
   0xf   :  { %p667_p7 = pnand %p666_p6, %p660_p3 }
  0x11   :  { %670 = shalt.err (!%p667_p7)
}
  0x12   :  { %s745_s13 = smov 64   ;;  %s746_s14 = smov 4  }
  0x13   :  { %40 = dma.hbm_to_vmem [thread:$0]  %s895_s2, 1024, %s35_s25, [#allocation6], %s745_s13, %s745_s13, %s746_s14  }
  0x14   :  { %s671_s19 = scalar_lea.hbm %s893_s0, 512 }
  0x15   :  { %p672_p8 = scmp.ne.s32.totalorder %s893_s0, %s671_s19  ;;  %p675_p9 = scmp.lt.u32.totalorder %s671_s19, %s893_s0 }
  0x17   :  { %p677_p10 = pnand %p675_p9, %p672_p8 }
  0x19   :  { %680 = shalt.err (!%p677_p10)
}
  0x1a   :  { %s681_s24 = scalar_lea.vmem %s792_s27, 512  ;;  %p686_p12 = scmp.lt.s32.totalorder %s792_s27, %s792_s27 }
  0x1b   :  { %p682_p11 = scmp.ne.s32.totalorder %s792_s27, %s681_s24  ;;  %p687_p13 = scmp.lt.s32.totalorder %s681_s24, %s681_s24 }
  0x1d   :  { %p688_p0 = por %p687_p13, %p686_p12 }
  0x1f   :  { %p689_p1 = pnand %p688_p0, %p682_p11 }
  0x21   :  { %692 = shalt.err (!%p689_p1)
}
  0x22   :  { %26 = dma.hbm_to_vmem [thread:$0]  %s893_s0, 512, %s792_s27, [#allocation3], %s745_s13, %s745_s13, %s746_s14  }
  0x23   :  { %s747_s26 = smov [#allocation7]   ;;  %s693_s8 = scalar_lea.hbm %s898_s5, 1024 }
  0x24   :  { %s50_s28 = sshll.u32 %s747_s26, 4  ;;  %p694_p2 = scmp.ne.s32.totalorder %s898_s5, %s693_s8  ;;  %s51_s28 = int_to_ptr.vmem [resolvable:$true] %s50_s28 }
  0x25   :  { %p697_p3 = scmp.lt.u32.totalorder %s693_s8, %s898_s5 }
  0x27   :  { %p699_p4 = pnand %p697_p3, %p694_p2 }
  0x29   :  { %702 = shalt.err (!%p699_p4)
}
  0x2a   :  { %s703_s15 = scalar_lea.vmem %s51_s28, 1024  ;;  %p708_p6 = scmp.lt.s32.totalorder %s51_s28, %s51_s28 }
  0x2b   :  { %p704_p5 = scmp.ne.s32.totalorder %s51_s28, %s703_s15  ;;  %p709_p7 = scmp.lt.s32.totalorder %s703_s15, %s703_s15 }
  0x2d   :  { %p710_p8 = por %p709_p7, %p708_p6 }
  0x2f   :  { %p711_p9 = pnand %p710_p8, %p704_p5 }
  0x31   :  { %714 = shalt.err (!%p711_p9)
}
  0x32   :  { %56 = dma.hbm_to_vmem [thread:$0]  %s898_s5, 1024, %s51_s28, [#allocation6], %s745_s13, %s745_s13, %s746_s14  }
  0x33   :  { %737 = dma.done.wait [#allocation3], 512  }
  0x34   :  { %738 = vsyncadd [#allocation3], 4294966784 }
  0x35   :  { %739 = dma.done.wait [#allocation6], 2048  }
  0x36   :  { %740 = vsyncadd [#allocation6], 4294965248  ;;  %v625_v0 = vld [vmem:[#allocation5] sm:$0xff]   ;;  %v626_v1 = vld [vmem:[#allocation5 + $0x8] sm:$0xff]   ;;  %v748_v12 = vmov 0.0   ;;  %vm749_vm0 = vmmov 0   ;;  %v238_v13 = vlaneseq }
  0x37   :  { %548 = vmatprep.subr.bf16.mxu0 %v625_v0  ;;  %v627_v2 = vld [vmem:[#allocation5 + $0x10] sm:$0xff]   ;;  %v628_v3 = vld [vmem:[#allocation5 + $0x18] sm:$0xff]   ;;  %v633_v4 = vld [vmem:[#allocation2] sm:$0xff]   ;;  %572 = vmatprep.subr.bf16.mxu1 %v748_v12  ;;  %v750_v26 = vmov 0   ;;  %vm310_vm5 = vcmask 523264   ;;  %s751_s18 = smov [#allocation8]  }
  0x38   :  { %549 = vmatpush3.bf16.msra.mxu0 %v625_v0  ;;  %564 = vmatprep.mubr.bf16.mxu0 %v633_v4  ;;  %v629_v5 = vld [vmem:[#allocation5 + $0x20] sm:$0xff]   ;;  %v630_v6 = vld [vmem:[#allocation5 + $0x28] sm:$0xff]   ;;  %v631_v7 = vld [vmem:[#allocation5 + $0x30] sm:$0xff]   ;;  %v239_v14 = vshrl.u32 %v238_v13, 7  ;;  %v297_v42 = vand.u32 127, %v238_v13  ;;  %s485_s19 = sshll.u32 %s751_s18, 4  ;;  %s486_s19 = int_to_ptr.vmem [resolvable:$true] %s485_s19 }
  0x39   :  { %550 = vmatprep.subr.bf16.mxu0 %v626_v1  ;;  %v632_v8 = vld [vmem:[#allocation5 + $0x38] sm:$0xff]   ;;  %v634_v9 = vld [vmem:[#allocation2 + $0x8] sm:$0xff]   ;;  %v635_v10 = vld [vmem:[#allocation2 + $0x10] sm:$0xff]   ;;  %580 = vmatprep.mubr.msk.bf16.mxu1 %vm749_vm0, %v748_v12  ;;  %s715_s20 = scalar_lea.vmem %s486_s19, 128  ;;  %p720_p11 = scmp.lt.s32.totalorder %s486_s19, %s486_s19 }
  0x3a   :  { %v636_v11 = vld [vmem:[#allocation2 + $0x18] sm:$0xff]   ;;  %v234_v15 = vld [vmem:[%s896_s3] sm:$0x1]  ;;  %v240_v17 = vsub.s32 0, %v239_v14  ;;  %v298_v41 = vmul.u32 8, %v239_v14  ;;  %v638_v60 = vld [vmem:[#allocation7 + $0x8] sm:$0xff]   ;;  %p716_p10 = scmp.ne.s32.totalorder %s486_s19, %s715_s20  ;;  %p721_p12 = scmp.lt.s32.totalorder %s715_s20, %s715_s20 }
  0x3b   :  { %v236_v16 = vpack.i.b16 %v234_v15, %v234_v15  ;;  %v250_v40 = vld [vmem:[%s897_s4] sm:$0x1]  ;;  %v639_v61 = vld [vmem:[#allocation7 + $0x10] sm:$0xff]   ;;  %v640_v62 = vld [vmem:[#allocation7 + $0x18] sm:$0xff]  }
  0x3c   :  { %551 = vmatpush3.bf16.msra.mxu0 %v626_v1  ;;  %v300_v43 = vadd.s32 8, %v298_v41  ;;  %v251_v44 = vld [vmem:[%s894_s1] sm:$0x1]  ;;  %vm299_vm2 = vcmp.ge.s32.totalorder %v297_v42, %v298_v41  ;;  %v642_v0 = vld [vmem:[#allocation7 + $0x28] sm:$0xff]   ;;  %v643_v1 = vld [vmem:[#allocation7 + $0x30] sm:$0xff]   ;;  %p722_p13 = por %p721_p12, %p720_p11 }
  0x3d   :  { %552 = vmatprep.subr.bf16.mxu0 %v627_v2  ;;  %v241_v21 = vrot.slane %v236_v16, %v240_v17  ;;  %vm252_vm1 = vcmp.le.f32.partialorder %v251_v44, -5e+08  ;;  %v637_v59 = vld [vmem:[#allocation7] sm:$0xff]  }
  0x3e   :  { %vm301_vm3 = vcmp.lt.s32.totalorder %v297_v42, %v300_v43  ;;  %v641_v63 = vld [vmem:[#allocation7 + $0x20] sm:$0xff]   ;;  %p723_p0 = pnand %p722_p13, %p716_p10 }
  0x3f   :  { %vm302_vm4 = vmand %vm299_vm2, %vm301_vm3  ;;  %v508_v13 = vld [vmem:[%s899_s6] ss:$0 sm:$0xff] }
  0x40   :  { %553 = vmatpush3.bf16.msra.mxu0 %v627_v2 }
  0x41   :  { %554 = vmatprep.subr.bf16.mxu0 %v628_v3 }
  0x44   :  { %555 = vmatpush3.bf16.msra.mxu0 %v628_v3 }
  0x45   :  { %556 = vmatprep.subr.bf16.mxu0 %v629_v5 }
  0x48   :  { %557 = vmatpush3.bf16.msra.mxu0 %v629_v5 }
  0x49   :  { %558 = vmatprep.subr.bf16.mxu0 %v630_v6 }
  0x4c   :  { %559 = vmatpush3.bf16.msra.mxu0 %v630_v6  ;;  %v644_v6 = vld [vmem:[#allocation7 + $0x38] sm:$0xff]  }
  0x4d   :  { %560 = vmatprep.subr.bf16.mxu0 %v631_v7 }
  0x50   :  { %561 = vmatpush3.bf16.msra.mxu0 %v631_v7 }
  0x51   :  { %562 = vmatprep.subr.bf16.mxu0 %v632_v8 }
  0x54   :  { %563 = vmatpush3.bf16.msra.mxu0 %v632_v8 }
  0x55   :  { %584 = vmatprep.subr.bf16.mxu0 %v748_v12 }
  0x57   :  { %565 = vmatmul.mubr.bf16.vlgmr.msra.gmra.mrb[0].mxu0 %v634_v9 }
  0x58   :  { %568 = vmatprep.mubr.bf16.mxu0 %v635_v10  ;;  %585 = vmatpush3.bf16.msra.mxu0 %v633_v4 }
  0x59   :  { %586 = vmatprep.subr.bf16.mxu0 %v748_v12 }
  0x5c   :  { %587 = vmatpush3.bf16.msra.mxu0 %v634_v9 }
  0x5d   :  { %588 = vmatprep.subr.bf16.mxu0 %v748_v12 }
  0x5f   :  { %569 = vmatmul.mubr.bf16.gmra.mrb[4].mxu0 %v636_v11 }
  0x60   :  { %589 = vmatpush3.bf16.msra.mxu0 %v635_v10  ;;  %592 = vmatprep.mubr.msk.bf16.mxu0 %vm749_vm0, %v748_v12 }
  0x61   :  { %590 = vmatprep.subr.bf16.mxu0 %v748_v12 }
  0x64   :  { %591 = vmatpush3.bf16.msra.mxu0 %v636_v11 }
 0x12a   :  { %v566_v18 = vpop.f32.mrb[0].mxu0 }
 0x12b   :  { %v199_v19 = vpop.f32.mrb[1].mxu0 }
 0x12c   :  { %v567_v20 = vpop.f32.mrb[2].mxu0 }
 0x12d   :  { %v231_v22 = vpack.c.bf16 %v567_v20, %v566_v18  ;;  %v202_v23 = vpop.f32.mrb[3].mxu0 }
 0x12e   :  { %v230_v24 = vpack.c.bf16 %v202_v23, %v199_v19 }
 0x12f   :  { %v243_v33 = vadd.bf16 %v241_v21, %v231_v22 }
 0x130   :  { %v242_v25 = vadd.bf16 %v241_v21, %v230_v24 }
 0x131   :  { %v247_v35 = vmax.bf16 %v750_v26, %v243_v33 }
 0x132   :  { %v246_v27 = vmax.bf16 %v750_v26, %v242_v25  ;;  %v570_v28 = vpop.f32.mrb[4].mxu0 }
 0x133   :  { %v215_v29 = vpop.f32.mrb[5].mxu0 }
 0x134   :  { %573 = vmatpush3.bf16.xpose.msra.mxu1 %v246_v27  ;;  %v571_v30 = vpop.f32.mrb[6].mxu0 }
 0x135   :  { %v233_v31 = vpack.c.bf16 %v571_v30, %v570_v28  ;;  %v218_v32 = vpop.f32.mrb[7].mxu0  ;;  %574 = vmatprep.subr.bf16.mxu1 %v748_v12 }
 0x136   :  { %v232_v34 = vpack.c.bf16 %v218_v32, %v215_v29 }
 0x137   :  { %v245_v38 = vadd.bf16 %v241_v21, %v233_v31 }
 0x138   :  { %v244_v36 = vadd.bf16 %v241_v21, %v232_v34 }
 0x139   :  { %v249_v39 = vmax.bf16 %v750_v26, %v245_v38 }
 0x13a   :  { %v248_v37 = vmax.bf16 %v750_v26, %v244_v36 }
 0x13c   :  { %575 = vmatpush3.bf16.xpose.msra.mxu1 %v247_v35 }
 0x13d   :  { %576 = vmatprep.subr.bf16.mxu1 %v748_v12 }
 0x144   :  { %577 = vmatpush3.bf16.xpose.msra.mxu1 %v248_v37 }
 0x145   :  { %578 = vmatprep.subr.bf16.mxu1 %v748_v12 }
 0x14c   :  { %579 = vmatpush3.bf16.xpose.msra.mxu1 %v249_v39 }
 0x14d   :  { %596 = vmatprep.subr.bf16.mxu1 %v748_v12 }
 0x153   :  { %581 = vmatmul.mubr.bf16.vlgmr.msra.gmra.mrb[0].mxu1 %v250_v40 }
 0x154   :  { %612 = vmatprep.mubr.msk.bf16.mxu1 %vm749_vm0, %v748_v12  ;;  %597 = vmatpush3.bf16.msra.mxu1 %v637_v59 }
 0x155   :  { %598 = vmatprep.subr.bf16.mxu1 %v748_v12 }
 0x158   :  { %599 = vmatpush3.bf16.msra.mxu1 %v638_v60 }
 0x159   :  { %600 = vmatprep.subr.bf16.mxu1 %v748_v12 }
 0x15c   :  { %601 = vmatpush3.bf16.msra.mxu1 %v639_v61 }
 0x15d   :  { %602 = vmatprep.subr.bf16.mxu1 %v748_v12 }
 0x160   :  { %603 = vmatpush3.bf16.msra.mxu1 %v640_v62 }
 0x161   :  { %604 = vmatprep.subr.bf16.mxu1 %v748_v12 }
 0x164   :  { %605 = vmatpush3.bf16.msra.mxu1 %v641_v63 }
 0x165   :  { %606 = vmatprep.subr.bf16.mxu1 %v748_v12 }
 0x168   :  { %607 = vmatpush3.bf16.msra.mxu1 %v642_v0 }
 0x169   :  { %608 = vmatprep.subr.bf16.mxu1 %v748_v12 }
 0x16c   :  { %609 = vmatpush3.bf16.msra.mxu1 %v643_v1 }
 0x16d   :  { %610 = vmatprep.subr.bf16.mxu1 %v748_v12 }
 0x170   :  { %611 = vmatpush3.bf16.msra.mxu1 %v644_v6 }
 0x226   :  { %v287_v45 = vpop.f32.mrb[0].mxu1 }
 0x227   :  { %v288_v46 = vadd.f32 %v287_v45, %v251_v44  ;;  %v582_v47 = vpop.f32.mrb[1].mxu1 }
 0x228   :  { %v290_v48 = vpop.f32.mrb[2].mxu1 }
 0x229   :  { %v293_v49 = vsel %vm252_vm1, -1e+09, %v288_v46  ;;  %v583_v50 = vpop.f32.mrb[3].mxu1 }
 0x22a   :  { %v307_v51 = vrot.slane %v293_v49, %v240_v17 }
 0x22c   :  { %v309_v52 = vsel %vm302_vm4, %v307_v51, -2e+09 }
 0x22d   :  { %v311_v53 = vsel %vm310_vm5, %v309_v52, -inf }
 0x22e   :  { %312 = vmax.xlane.f32.xlu0 %v311_v53 }
 0x2bb   :  { %v313_v54 = vpop.xlane.xlu0 %312 }
 0x2bc   :  { %v314_v55 = vsub.f32 %v309_v52, %v313_v54 }
 0x2be   :  { %v315_v56 = vmul.f32 1.442695, %v314_v55 }
 0x2c0   :  { %645 = vpow2.f32 %v315_v56 }
 0x2ca   :  { %v646_v57 = vpop.eup %645 }
 0x2cb   :  { %v317_v58 = vsel %vm310_vm5, %v646_v57, 0.0 }
 0x2cc   :  { %318 = vadd.xlane.f32.xlu0 %v317_v58 }
 0x359   :  { %v319_v2 = vpop.xlane.xlu0 %318 }
 0x35a   :  { %647 = vrcp.f32 %v319_v2 }
 0x364   :  { %v648_v3 = vpop.eup %647 }
 0x365   :  { %v321_v4 = vmul.f32 %v648_v3, %v646_v57 }
 0x367   :  { %v322_v5 = vpack.c.bf16 %v321_v4, %v321_v4 }
 0x369   :  { %593 = vmatmul.mubr.msk.bf16.vlgmr.msra.gmra.mrb[8].mxu0 %vm310_vm5, %v322_v5 }
 0x43c   :  { %v360_v7 = vpop.f32.mrb[8].mxu0 }
 0x43d   :  { %v366_v8 = vpack.c.bf16 %v360_v7, %v360_v7  ;;  %v594_v9 = vpop.f32.mrb[9].mxu0 }
 0x43e   :  { %v363_v10 = vpop.f32.mrb[10].mxu0 }
 0x43f   :  { %v595_v11 = vpop.f32.mrb[11].mxu0  ;;  %613 = vmatmul.mubr.bf16.vlgmr.msra.gmra.mrb[4].mxu1 %v366_v8 }
 0x512   :  { %v472_v12 = vpop.f32.mrb[4].mxu1 }
 0x513   :  { %v473_v14 = vadd.f32 %v508_v13, %v472_v12  ;;  %v614_v15 = vpop.f32.mrb[5].mxu1 }
 0x514   :  { %v475_v16 = vpop.f32.mrb[6].mxu1 }
 0x515   :  { %478 = vst [vmem:[#allocation8] sm:$0xff] %v473_v14  ;;  %v615_v17 = vpop.f32.mrb[7].mxu1 }
 0x516   :  { %726 = shalt.err (!%p723_p0)
}
 0x517   :  { %s727_s6 = scalar_lea.hbm %s900_s7, 128 }
 0x518   :  { %p728_p1 = scmp.ne.s32.totalorder %s900_s7, %s727_s6  ;;  %p731_p2 = scmp.lt.u32.totalorder %s727_s6, %s900_s7 }
 0x51a   :  { %p733_p3 = pnand %p731_p2, %p728_p1 }
 0x51c   :  { %736 = shalt.err (!%p733_p3)
}
 0x51d   :  { %488 = dma.vmem_to_hbm [thread:$0]  %s486_s19, 128, %s900_s7, [#allocation4]  }
 0x51e   :  { %741 = dma.done.wait [#allocation4], 128  }
 0x51f   :  { %742 = vsyncadd [#allocation4], 4294967168 }
 0x520   :  { %492 = vsyncpa [#allocation3], 1 }
 0x521   :  { %493 = vsyncpa [#allocation6], 1 }
 0x522   :  { %494 = vsyncpa [#allocation4], 1 }

</bundles_post_ra>
